<compile_context>
chip_gen: v5e
topology: v5e:2x2
jax: 0.10.0
libtpu: 0.0.40
codegen_flags: <defaults>
</compile_context>

<pallas_src>
import functools

import jax
import jax.numpy as jnp
from jax import lax
from jax.experimental import pallas as pl
from jax.experimental.pallas import tpu as pltpu

C_IN = 3      # fixed by the module: Conv2d(3, 16, ...)
C_HID = 16
KH = KW = 3
LANE = 128


def _conv_encode_kernel(p_ref, w1_ref, b1_ref, sel_ref, w2_ref, b2_ref, o_ref,
                        *, inv_count):
    # p_ref:   [1, P, 27]      im2col patches of one image (P = H1*W1)
    # w1_ref:  [27, 16]        conv1 weight as GEMM matrix, b1_ref: [1, 16]
    # sel_ref: [9, P]          0/1 window-sum selector (one row per conv2 tap)
    # w2_ref:  [9, 16, E_pad]  conv2 weight per tap (lane-padded), b2_ref: [1, E_pad]
    # o_ref:   [1, 1, E_pad]
    p = p_ref[0]                                                # [P, 27]

    # ---- conv1 as GEMM (MXU) + bias + SiLU (VPU/EUP) ----
    h = jnp.dot(p, w1_ref[...], preferred_element_type=jnp.float32)
    h = h + b1_ref[...]
    h = h * (1.0 / (1.0 + jnp.exp(-h)))                         # SiLU = x * sigmoid(x)

    # ---- conv2 + global mean pooling, fused ----
    # window sums of h for each of the 9 conv2 taps -> [9, 16] (on the MXU)
    s = jnp.dot(sel_ref[...], h, preferred_element_type=jnp.float32)

    acc = jnp.zeros((1, o_ref.shape[-1]), jnp.float32)
    for t in range(KH * KW):                                    # unrolled 9 tiny GEMMs
        acc = acc + jnp.dot(s[t:t + 1, :], w2_ref[t],
                            preferred_element_type=jnp.float32)

    o_ref[0] = (acc * inv_count + b2_ref[...]).astype(o_ref.dtype)


def simple_conv_encode_forward(x, params):
    """x: [B, 3, H, W] float32 (NCHW, like PyTorch). Returns [B, embed_dim]."""
    B, C, H, W = x.shape
    assert C == C_IN
    H1, W1 = H - KH + 1, W - KW + 1        # conv1 output spatial
    H2, W2 = H1 - KH + 1, W1 - KW + 1      # conv2 output spatial
    P = H1 * W1
    KPATCH = KH * KW * C_IN

    w1, b1, w2, b2 = params["w1"], params["b1"], params["w2"], params["b2"]
    E = w2.shape[0]
    E_pad = ((E + LANE - 1) // LANE) * LANE  # lane-dense output (feedback #1)

    # ---------- layout plumbing (plain JAX, outside the kernel) ----------
    # im2col for conv1: patch features ordered (dy, dx, c_in), matching w1_mat rows.
    x_nhwc = jnp.transpose(x, (0, 2, 3, 1))                                  # [B,H,W,3]
    patches = jnp.concatenate(
        [x_nhwc[:, dy:dy + H1, dx:dx + W1, :]
         for dy in range(KH) for dx in range(KW)], axis=-1)                  # [B,H1,W1,27]
    patches = patches.reshape(B, P, KPATCH)

    # conv1 weight [16,3,3,3] (OIHW) -> GEMM matrix [27,16], rows ordered (dy,dx,c_in)
    w1_mat = jnp.transpose(w1, (2, 3, 1, 0)).reshape(KPATCH, C_HID)
    b1_row = b1.reshape(1, C_HID)

    # conv2 weight [E,16,3,3] -> per-tap [9,16,E], zero-padded to [9,16,E_pad]
    w2_tap = jnp.transpose(w2, (2, 3, 1, 0)).reshape(KH * KW, C_HID, E)
    w2_tap = jnp.pad(w2_tap, ((0, 0), (0, 0), (0, E_pad - E)))
    b2_row = jnp.pad(b2.reshape(1, E), ((0, 0), (0, E_pad - E)))

    # 0/1 selector: sel[t, u*W1+v] = 1 iff conv1-output position (u,v) lies inside the
    # H2 x W2 window of tap t=(dy,dx).  Turns conv2 + mean into pure MXU work.
    u = jnp.arange(H1)[:, None]
    v = jnp.arange(W1)[None, :]
    sel = jnp.stack(
        [((u >= dy) & (u < dy + H2) & (v >= dx) & (v < dx + W2))
         .astype(jnp.float32).reshape(P)
         for dy in range(KH) for dx in range(KW)], axis=0)                   # [9, P]

    kernel = functools.partial(_conv_encode_kernel, inv_count=1.0 / float(H2 * W2))

    out = pl.pallas_call(
        kernel,
        out_shape=jax.ShapeDtypeStruct((B, 1, E_pad), x.dtype),
        grid=(B,),
        in_specs=[
            pl.BlockSpec((1, P, KPATCH), lambda b: (b, 0, 0)),            # patches
            pl.BlockSpec((KPATCH, C_HID), lambda b: (0, 0)),              # w1_mat
            pl.BlockSpec((1, C_HID), lambda b: (0, 0)),                   # b1
            pl.BlockSpec((KH * KW, P), lambda b: (0, 0)),                 # sel
            pl.BlockSpec((KH * KW, C_HID, E_pad), lambda b: (0, 0, 0)),   # w2_tap
            pl.BlockSpec((1, E_pad), lambda b: (0, 0)),                   # b2
        ],
        out_specs=pl.BlockSpec((1, 1, E_pad), lambda b: (b, 0, 0)),
        compiler_params=pltpu.CompilerParams(
            dimension_semantics=("parallel",)),
    )(patches, w1_mat, b1_row, sel, w2_tap, b2_row)

    return out[:, 0, :E]


def init_params(key, embed_dim):
    """PyTorch-shaped params: Conv2d weights OIHW, biases 1-D."""
    k1, k2, k3, k4 = jax.random.split(key, 4)
    bnd1 = 1.0 / (C_IN * KH * KW) ** 0.5
    bnd2 = 1.0 / (C_HID * KH * KW) ** 0.5
    return {
        "w1": jax.random.uniform(k1, (C_HID, C_IN, KH, KW), jnp.float32, -bnd1, bnd1),
        "b1": jax.random.uniform(k2, (C_HID,), jnp.float32, -bnd1, bnd1),
        "w2": jax.random.uniform(k3, (embed_dim, C_HID, KH, KW), jnp.float32, -bnd2, bnd2),
        "b2": jax.random.uniform(k4, (embed_dim,), jnp.float32, -bnd2, bnd2),
    }


def _reference_forward(x, params):
    """Pure-JAX reference with identical semantics (for a sanity check)."""
    dn = ("NCHW", "OIHW", "NCHW")
    h = lax.conv_general_dilated(x, params["w1"], (1, 1), "VALID",
                                 dimension_numbers=dn)
    h = h + params["b1"][None, :, None, None]
    h = h * jax.nn.sigmoid(h)
    o = lax.conv_general_dilated(h, params["w2"], (1, 1), "VALID",
                                 dimension_numbers=dn)
    o = o + params["b2"][None, :, None, None]
    return jnp.mean(o, axis=(2, 3))


if __name__ == "__main__":
    key = jax.random.PRNGKey(0)
    k_param, k_x = jax.random.split(key)

    batch = 2
    H = W = 16
    embed_dim = 32

    params = init_params(k_param, embed_dim)
    x = jax.random.normal(k_x, (batch, C_IN, H, W), jnp.float32)

    out = simple_conv_encode_forward(x, params)
    out = jax.block_until_ready(out)

    ref = _reference_forward(x, params)
    assert out.shape == (batch, embed_dim)
    assert jnp.allclose(out, ref, atol=1e-4, rtol=1e-4), \
        float(jnp.max(jnp.abs(out - ref)))

    print("KERNEL_OK")
</pallas_src>

<mosaic_0001>
module attributes {stable_mosaic.version = 11 : i64} {
  func.func @_conv_encode_kernel(%arg0: i32, %arg1: memref<1x196x27xf32, #tpu.memory_space<vmem>>, %arg2: memref<27x16xf32, #tpu.memory_space<vmem>>, %arg3: memref<1x16xf32, #tpu.memory_space<vmem>>, %arg4: memref<9x196xf32, #tpu.memory_space<vmem>>, %arg5: memref<9x16x128xf32, #tpu.memory_space<vmem>>, %arg6: memref<1x128xf32, #tpu.memory_space<vmem>>, %arg7: memref<1x1x128xf32, #tpu.memory_space<vmem>>) attributes {dimension_semantics = [#tpu.dimension_semantics<parallel>], iteration_bounds = array<i64: 2>, scalar_prefetch = 0 : i64, scratch_operands = 0 : i64, tpu.core_type = #tpu.core_type<tc>, window_params = [{transform_indices = @transform_0, window_bounds = array<i64: 1, 196, 27>}, {pipeline_mode = #tpu.pipeline_mode<synchronous>, transform_indices = @transform_1, window_bounds = array<i64: 27, 16>}, {pipeline_mode = #tpu.pipeline_mode<synchronous>, transform_indices = @transform_2, window_bounds = array<i64: 1, 16>}, {pipeline_mode = #tpu.pipeline_mode<synchronous>, transform_indices = @transform_3, window_bounds = array<i64: 9, 196>}, {pipeline_mode = #tpu.pipeline_mode<synchronous>, transform_indices = @transform_4, window_bounds = array<i64: 9, 16, 128>}, {pipeline_mode = #tpu.pipeline_mode<synchronous>, transform_indices = @transform_5, window_bounds = array<i64: 1, 128>}, {transform_indices = @transform_6, window_bounds = array<i64: 1, 1, 128>}]} {
    %c0 = arith.constant 0 : index
    %c0_0 = arith.constant 0 : index
    %c0_1 = arith.constant 0 : index
    %0 = vector.load %arg1[%c0, %c0_0, %c0_1] : memref<1x196x27xf32, #tpu.memory_space<vmem>>, vector<1x196x27xf32>
    %1 = vector.shape_cast %0 : vector<1x196x27xf32> to vector<196x27xf32>
    %c0_2 = arith.constant 0 : index
    %c0_3 = arith.constant 0 : index
    %2 = vector.load %arg2[%c0_2, %c0_3] : memref<27x16xf32, #tpu.memory_space<vmem>>, vector<27x16xf32>
    %cst = arith.constant dense<0.000000e+00> : vector<196x16xf32>
    %3 = tpu.matmul %1, %2, %cst {dimension_numbers = #tpu.dot_dimension_numbers<[1], [0], [0], [1], [0, 0, 1, 1], [], []>} : vector<196x27xf32>, vector<27x16xf32>, vector<196x16xf32> -> vector<196x16xf32>
    %c0_4 = arith.constant 0 : index
    %c0_5 = arith.constant 0 : index
    %4 = vector.load %arg3[%c0_4, %c0_5] : memref<1x16xf32, #tpu.memory_space<vmem>>, vector<1x16xf32>
    %5 = vector.broadcast %4 : vector<1x16xf32> to vector<196x16xf32>
    %6 = arith.addf %3, %5 : vector<196x16xf32>
    %cst_6 = arith.constant 0.000000e+00 : f32
    %7 = vector.broadcast %cst_6 : f32 to vector<196x16xf32>
    %8 = arith.subf %7, %6 : vector<196x16xf32>
    %9 = math.exp %8 : vector<196x16xf32>
    %cst_7 = arith.constant 1.000000e+00 : f32
    %10 = vector.broadcast %cst_7 : f32 to vector<196x16xf32>
    %11 = arith.addf %10, %9 : vector<196x16xf32>
    %cst_8 = arith.constant 1.000000e+00 : f32
    %12 = vector.broadcast %cst_8 : f32 to vector<196x16xf32>
    %13 = arith.divf %12, %11 : vector<196x16xf32>
    %14 = arith.mulf %6, %13 : vector<196x16xf32>
    %c0_9 = arith.constant 0 : index
    %c0_10 = arith.constant 0 : index
    %15 = vector.load %arg4[%c0_9, %c0_10] : memref<9x196xf32, #tpu.memory_space<vmem>>, vector<9x196xf32>
    %cst_11 = arith.constant dense<0.000000e+00> : vector<9x16xf32>
    %16 = tpu.matmul %15, %14, %cst_11 {dimension_numbers = #tpu.dot_dimension_numbers<[1], [0], [0], [1], [0, 0, 1, 1], [], []>} : vector<9x196xf32>, vector<196x16xf32>, vector<9x16xf32> -> vector<9x16xf32>
    %cst_12 = arith.constant 0.000000e+00 : f32
    %17 = vector.broadcast %cst_12 : f32 to vector<1x128xf32>
    %18 = vector.extract_strided_slice %16 {offsets = [0, 0], sizes = [1, 16], strides = [1, 1]} : vector<9x16xf32> to vector<1x16xf32>
    %c0_13 = arith.constant 0 : index
    %c0_14 = arith.constant 0 : index
    %c0_15 = arith.constant 0 : index
    %19 = vector.load %arg5[%c0_13, %c0_14, %c0_15] : memref<9x16x128xf32, #tpu.memory_space<vmem>>, vector<1x16x128xf32>
    %20 = vector.shape_cast %19 : vector<1x16x128xf32> to vector<16x128xf32>
    %cst_16 = arith.constant dense<0.000000e+00> : vector<1x128xf32>
    %21 = tpu.matmul %18, %20, %cst_16 {dimension_numbers = #tpu.dot_dimension_numbers<[1], [0], [0], [1], [0, 0, 1, 1], [], []>} : vector<1x16xf32>, vector<16x128xf32>, vector<1x128xf32> -> vector<1x128xf32>
    %22 = arith.addf %17, %21 : vector<1x128xf32>
    %23 = vector.extract_strided_slice %16 {offsets = [1, 0], sizes = [1, 16], strides = [1, 1]} : vector<9x16xf32> to vector<1x16xf32>
    %c1 = arith.constant 1 : index
    %c0_17 = arith.constant 0 : index
    %c0_18 = arith.constant 0 : index
    %24 = vector.load %arg5[%c1, %c0_17, %c0_18] : memref<9x16x128xf32, #tpu.memory_space<vmem>>, vector<1x16x128xf32>
    %25 = vector.shape_cast %24 : vector<1x16x128xf32> to vector<16x128xf32>
    %cst_19 = arith.constant dense<0.000000e+00> : vector<1x128xf32>
    %26 = tpu.matmul %23, %25, %cst_19 {dimension_numbers = #tpu.dot_dimension_numbers<[1], [0], [0], [1], [0, 0, 1, 1], [], []>} : vector<1x16xf32>, vector<16x128xf32>, vector<1x128xf32> -> vector<1x128xf32>
    %27 = arith.addf %22, %26 : vector<1x128xf32>
    %28 = vector.extract_strided_slice %16 {offsets = [2, 0], sizes = [1, 16], strides = [1, 1]} : vector<9x16xf32> to vector<1x16xf32>
    %c2 = arith.constant 2 : index
    %c0_20 = arith.constant 0 : index
    %c0_21 = arith.constant 0 : index
    %29 = vector.load %arg5[%c2, %c0_20, %c0_21] : memref<9x16x128xf32, #tpu.memory_space<vmem>>, vector<1x16x128xf32>
    %30 = vector.shape_cast %29 : vector<1x16x128xf32> to vector<16x128xf32>
    %cst_22 = arith.constant dense<0.000000e+00> : vector<1x128xf32>
    %31 = tpu.matmul %28, %30, %cst_22 {dimension_numbers = #tpu.dot_dimension_numbers<[1], [0], [0], [1], [0, 0, 1, 1], [], []>} : vector<1x16xf32>, vector<16x128xf32>, vector<1x128xf32> -> vector<1x128xf32>
    %32 = arith.addf %27, %31 : vector<1x128xf32>
    %33 = vector.extract_strided_slice %16 {offsets = [3, 0], sizes = [1, 16], strides = [1, 1]} : vector<9x16xf32> to vector<1x16xf32>
    %c3 = arith.constant 3 : index
    %c0_23 = arith.constant 0 : index
    %c0_24 = arith.constant 0 : index
    %34 = vector.load %arg5[%c3, %c0_23, %c0_24] : memref<9x16x128xf32, #tpu.memory_space<vmem>>, vector<1x16x128xf32>
    %35 = vector.shape_cast %34 : vector<1x16x128xf32> to vector<16x128xf32>
    %cst_25 = arith.constant dense<0.000000e+00> : vector<1x128xf32>
    %36 = tpu.matmul %33, %35, %cst_25 {dimension_numbers = #tpu.dot_dimension_numbers<[1], [0], [0], [1], [0, 0, 1, 1], [], []>} : vector<1x16xf32>, vector<16x128xf32>, vector<1x128xf32> -> vector<1x128xf32>
    %37 = arith.addf %32, %36 : vector<1x128xf32>
    %38 = vector.extract_strided_slice %16 {offsets = [4, 0], sizes = [1, 16], strides = [1, 1]} : vector<9x16xf32> to vector<1x16xf32>
    %c4 = arith.constant 4 : index
    %c0_26 = arith.constant 0 : index
    %c0_27 = arith.constant 0 : index
    %39 = vector.load %arg5[%c4, %c0_26, %c0_27] : memref<9x16x128xf32, #tpu.memory_space<vmem>>, vector<1x16x128xf32>
    %40 = vector.shape_cast %39 : vector<1x16x128xf32> to vector<16x128xf32>
    %cst_28 = arith.constant dense<0.000000e+00> : vector<1x128xf32>
    %41 = tpu.matmul %38, %40, %cst_28 {dimension_numbers = #tpu.dot_dimension_numbers<[1], [0], [0], [1], [0, 0, 1, 1], [], []>} : vector<1x16xf32>, vector<16x128xf32>, vector<1x128xf32> -> vector<1x128xf32>
    %42 = arith.addf %37, %41 : vector<1x128xf32>
    %43 = vector.extract_strided_slice %16 {offsets = [5, 0], sizes = [1, 16], strides = [1, 1]} : vector<9x16xf32> to vector<1x16xf32>
    %c5 = arith.constant 5 : index
    %c0_29 = arith.constant 0 : index
    %c0_30 = arith.constant 0 : index
    %44 = vector.load %arg5[%c5, %c0_29, %c0_30] : memref<9x16x128xf32, #tpu.memory_space<vmem>>, vector<1x16x128xf32>
    %45 = vector.shape_cast %44 : vector<1x16x128xf32> to vector<16x128xf32>
    %cst_31 = arith.constant dense<0.000000e+00> : vector<1x128xf32>
    %46 = tpu.matmul %43, %45, %cst_31 {dimension_numbers = #tpu.dot_dimension_numbers<[1], [0], [0], [1], [0, 0, 1, 1], [], []>} : vector<1x16xf32>, vector<16x128xf32>, vector<1x128xf32> -> vector<1x128xf32>
    %47 = arith.addf %42, %46 : vector<1x128xf32>
    %48 = vector.extract_strided_slice %16 {offsets = [6, 0], sizes = [1, 16], strides = [1, 1]} : vector<9x16xf32> to vector<1x16xf32>
    %c6 = arith.constant 6 : index
    %c0_32 = arith.constant 0 : index
    %c0_33 = arith.constant 0 : index
    %49 = vector.load %arg5[%c6, %c0_32, %c0_33] : memref<9x16x128xf32, #tpu.memory_space<vmem>>, vector<1x16x128xf32>
    %50 = vector.shape_cast %49 : vector<1x16x128xf32> to vector<16x128xf32>
    %cst_34 = arith.constant dense<0.000000e+00> : vector<1x128xf32>
    %51 = tpu.matmul %48, %50, %cst_34 {dimension_numbers = #tpu.dot_dimension_numbers<[1], [0], [0], [1], [0, 0, 1, 1], [], []>} : vector<1x16xf32>, vector<16x128xf32>, vector<1x128xf32> -> vector<1x128xf32>
    %52 = arith.addf %47, %51 : vector<1x128xf32>
    %53 = vector.extract_strided_slice %16 {offsets = [7, 0], sizes = [1, 16], strides = [1, 1]} : vector<9x16xf32> to vector<1x16xf32>
    %c7 = arith.constant 7 : index
    %c0_35 = arith.constant 0 : index
    %c0_36 = arith.constant 0 : index
    %54 = vector.load %arg5[%c7, %c0_35, %c0_36] : memref<9x16x128xf32, #tpu.memory_space<vmem>>, vector<1x16x128xf32>
    %55 = vector.shape_cast %54 : vector<1x16x128xf32> to vector<16x128xf32>
    %cst_37 = arith.constant dense<0.000000e+00> : vector<1x128xf32>
    %56 = tpu.matmul %53, %55, %cst_37 {dimension_numbers = #tpu.dot_dimension_numbers<[1], [0], [0], [1], [0, 0, 1, 1], [], []>} : vector<1x16xf32>, vector<16x128xf32>, vector<1x128xf32> -> vector<1x128xf32>
    %57 = arith.addf %52, %56 : vector<1x128xf32>
    %58 = vector.extract_strided_slice %16 {offsets = [8, 0], sizes = [1, 16], strides = [1, 1]} : vector<9x16xf32> to vector<1x16xf32>
    %c8 = arith.constant 8 : index
    %c0_38 = arith.constant 0 : index
    %c0_39 = arith.constant 0 : index
    %59 = vector.load %arg5[%c8, %c0_38, %c0_39] : memref<9x16x128xf32, #tpu.memory_space<vmem>>, vector<1x16x128xf32>
    %60 = vector.shape_cast %59 : vector<1x16x128xf32> to vector<16x128xf32>
    %cst_40 = arith.constant dense<0.000000e+00> : vector<1x128xf32>
    %61 = tpu.matmul %58, %60, %cst_40 {dimension_numbers = #tpu.dot_dimension_numbers<[1], [0], [0], [1], [0, 0, 1, 1], [], []>} : vector<1x16xf32>, vector<16x128xf32>, vector<1x128xf32> -> vector<1x128xf32>
    %62 = arith.addf %57, %61 : vector<1x128xf32>
    %cst_41 = arith.constant 0.0069444445 : f32
    %63 = vector.broadcast %cst_41 : f32 to vector<1x128xf32>
    %64 = arith.mulf %62, %63 : vector<1x128xf32>
    %c0_42 = arith.constant 0 : index
    %c0_43 = arith.constant 0 : index
    %65 = vector.load %arg6[%c0_42, %c0_43] : memref<1x128xf32, #tpu.memory_space<vmem>>, vector<1x128xf32>
    %66 = arith.addf %64, %65 : vector<1x128xf32>
    %c0_44 = arith.constant 0 : index
    %c0_45 = arith.constant 0 : index
    %c0_46 = arith.constant 0 : index
    %67 = vector.load %arg7[%c0_44, %c0_45, %c0_46] : memref<1x1x128xf32, #tpu.memory_space<vmem>>, vector<1x1x128xf32>
    %68 = vector.shape_cast %67 : vector<1x1x128xf32> to vector<1x128xf32>
    %69 = vector.shape_cast %66 : vector<1x128xf32> to vector<1x1x128xf32>
    tpu.vector_store %arg7[%c0_44, %c0_45, %c0_46], %69 {strides = array<i32>} : memref<1x1x128xf32, #tpu.memory_space<vmem>>, vector<1x1x128xf32>,
    return
  }
  func.func @transform_0(%arg0: i32) -> (i32, i32, i32) {
    %c0_i32 = arith.constant 0 : i32
    %c0_i32_0 = arith.constant 0 : i32
    %c0_i32_1 = arith.constant 0 : i32
    return %arg0, %c0_i32, %c0_i32_0 : i32, i32, i32
  }
  func.func @transform_1(%arg0: i32) -> (i32, i32) {
    %c0_i32 = arith.constant 0 : i32
    %c0_i32_0 = arith.constant 0 : i32
    %c0_i32_1 = arith.constant 0 : i32
    return %c0_i32, %c0_i32_0 : i32, i32
  }
  func.func @transform_2(%arg0: i32) -> (i32, i32) {
    %c0_i32 = arith.constant 0 : i32
    %c0_i32_0 = arith.constant 0 : i32
    %c0_i32_1 = arith.constant 0 : i32
    return %c0_i32, %c0_i32_0 : i32, i32
  }
  func.func @transform_3(%arg0: i32) -> (i32, i32) {
    %c0_i32 = arith.constant 0 : i32
    %c0_i32_0 = arith.constant 0 : i32
    %c0_i32_1 = arith.constant 0 : i32
    return %c0_i32, %c0_i32_0 : i32, i32
  }
  func.func @transform_4(%arg0: i32) -> (i32, i32, i32) {
    %c0_i32 = arith.constant 0 : i32
    %c0_i32_0 = arith.constant 0 : i32
    %c0_i32_1 = arith.constant 0 : i32
    %c0_i32_2 = arith.constant 0 : i32
    return %c0_i32, %c0_i32_0, %c0_i32_1 : i32, i32, i32
  }
  func.func @transform_5(%arg0: i32) -> (i32, i32) {
    %c0_i32 = arith.constant 0 : i32
    %c0_i32_0 = arith.constant 0 : i32
    %c0_i32_1 = arith.constant 0 : i32
    return %c0_i32, %c0_i32_0 : i32, i32
  }
  func.func @transform_6(%arg0: i32) -> (i32, i32, i32) {
    %c0_i32 = arith.constant 0 : i32
    %c0_i32_0 = arith.constant 0 : i32
    %c0_i32_1 = arith.constant 0 : i32
    return %arg0, %c0_i32, %c0_i32_0 : i32, i32, i32
  }
}

</mosaic_0001>

<bundles_post_ra>
// kernel: tpu_custom_call.1
= control target key start
LH: loop header
LB: loop body
LE: loop exit
PB: predicated region body
PF: predicated region fallthrough
CT: control target
= control target key end

     0   :  { %11 = vsyncpa [#allocation3], 0  ;;  %s2558_s0 = inlined_call_operand.vmem [shape: f32[2,196,27], index: 0, kind: input, shape index: {}]   ;;  %s2559_s1 = inlined_call_operand.vmem [shape: f32[27,16], index: 1, kind: input, shape index: {}]   ;;  %s2560_s2 = inlined_call_operand.vmem [shape: f32[1,16], index: 2, kind: input, shape index: {}]   ;;  %s2561_s3 = inlined_call_operand.vmem [shape: f32[9,196], index: 3, kind: input, shape index: {}]   ;;  %s2562_s4 = inlined_call_operand.vmem [shape: f32[9,16,128], index: 4, kind: input, shape index: {}]   ;;  %s2563_s5 = inlined_call_operand.vmem [shape: f32[1,128], index: 5, kind: input, shape index: {}]   ;;  %s2564_s6 = inlined_call_operand.hbm [shape: f32[2,1,128], index: 6, kind: output, shape index: {}]  }
   0x1   :  { %13 = vsyncpa [#allocation3 + $0x1], 0  ;;  %s1641_s21 = smov 0   ;;  %s1643_s22 = smov 0  }
   0x2   :  { %s1645_s23 = smov 0   ;;  %s1647_s24 = smov 0  }
   0x3 LB: > { %s1662_s25 = sadd.s32 4294967295, %s1604_s24   ;;  %s1328_s26 = sadd.s32 4294967294, %s1604_s24   ;;  %s1604_s24 = sphi %s1647_s24, %s2672_s24   ;;  %s1600_s23 = sphi %s1645_s23, %s2671_s23   ;;  %s1596_s22 = sphi %s1643_s22, %s2670_s22   ;;  %s1592_s21 = sphi %s1641_s21, %s2669_s21  }
   0x4   : > { %s1666_s27 = sadd.s32 1, %s1604_s24   ;;  %s157_s28 = sadd.s32 1, %s1600_s23 }
   0x5   : > { %s154_s29 = ssub.s32 %s1604_s24, %s1666_s27  ;;  %p167_p0 = scmp.ne.s32.totalorder %s1600_s23, %s1596_s22 }
   0x6   : > { %p155_p1 = scmp.eq.s32.totalorder %s154_s29, 0  ;;  %p168_p2 = scmp.eq.s32.totalorder %s1662_s25, 1 }
   0x7   : > { %p173_p3 = scmp.ne.s32.totalorder %s1596_s22, %s1592_s21  ;;  %p174_p4 = scmp.eq.s32.totalorder %s1328_s26, 1 }
   0x8   : > { %s1677_s30 = scalar_select %p155_p1, %s1600_s23, %s157_s28  }
   0x9   : > { %p1679_p5 = por %p168_p2, %p167_p0  ;;  %p1683_p6 = por %p174_p4, %p173_p3 }
   0xa   : > { %p1331_p7 = scmp.ge.s32.totalorder %s1604_s24, 1  ;;  %p215_p8 = scmp.lt.s32.totalorder %s1604_s24, 3 }
   0xc   : > { %p216_p9 = pnand %p1331_p7, %p215_p8 }
   0xe   : > { %219 = sbr.rel (%p216_p9) target bundleno = 605 (0x25d), region = 44 }
  0x13   : > { %v277_v0 = vld [vmem:[%s2559_s1 + $0x18] sm:$0x7]  ;;  %vm358_vm0 = vcmask 1042432   ;;  %v276_v1 = vld [vmem:[%s2559_s1 + $0x10] sm:$0xff]  ;;  %p244_p10 = scmp.lt.s32.totalorder %s1662_s25, 1  ;;  %v275_v2 = vld [vmem:[%s2559_s1 + $0x8] sm:$0xff]  ;;  %s1269_s11 = scalar_lea.hbm %s2564_s6, %s1662_s25 }
  0x14   : > { %1333 = vmatpush.msk.msra.mxu0 %vm358_vm0, %v277_v0  ;;  %1389 = vmatpush.msk.msra.mxu1 %vm358_vm0, %v277_v0  ;;  %v274_v3 = vld [vmem:[%s2559_s1] sm:$0xff]  ;;  %vm282_vm1 = vcmask 220160   ;;  %vm965_vm12 = vcmask 1043456   ;;  %s242_s29 = sand.u32 1, %s1596_s22   ;;  %s1273_s16 = sshll.u32 %s1269_s11, 4  ;;  %s1274_s16 = int_to_ptr.hbm [resolvable:$true] %s1273_s16 }
  0x15   : > { %1390 = vmatpush.msk.msra.mxu2 %vm358_vm0, %v277_v0  ;;  %1391 = vmatpush.msk.msra.mxu3 %vm358_vm0, %v277_v0  ;;  %s245_s15 = scalar_select %p244_p10, %s1662_s25, 1  ;;  %v1761_v29 = vld [vmem:[%s2560_s2] ss:$0 sm:$0xff] }
  0x16   : > { %375 = vmatpush.msra.mxu0 %v276_v1  ;;  %1392 = vmatpush.msra.mxu1 %v276_v1  ;;  %s243_s14 = scalar_lea.vmem [#allocation2], %s242_s29  ;;  %s1261_s17 = scalar_lea.sflag [#allocation3], %s242_s29 }
  0x17   : > { %1393 = vmatpush.msra.mxu2 %v276_v1  ;;  %1394 = vmatpush.msra.mxu3 %v276_v1  ;;  %s1401_s18 = smul.u32 200, %s245_s15  ;;  %s1271_s15 = sshll.u32 %s243_s14, 4  ;;  %s1272_s15 = int_to_ptr.vmem [resolvable:$true] %s1271_s15 }
  0x18   : > { %376 = vmatpush.msra.mxu0 %v275_v2  ;;  %1395 = vmatpush.msra.mxu1 %v275_v2 }
  0x19   : > { %1396 = vmatpush.msra.mxu2 %v275_v2  ;;  %1397 = vmatpush.msra.mxu3 %v275_v2  ;;  %s1706_s26 = scalar_lea.vmem %s2558_s0, %s1401_s18  ;;  %s1556_s18 = sshra.s32 %s1274_s16, 4  ;;  %s1557_s18 = int_to_ptr.hbm [resolvable:$true] %s1556_s18 }
  0x1a   : > { %377 = vmatpush.msra.mxu0 %v274_v3  ;;  %1398 = vmatpush.msra.mxu1 %v274_v3  ;;  %v249_v4 = vld [vmem:[%s1706_s26] sm:$0xff]  ;;  %v259_v5 = vld [vmem:[%s1706_s26 + $0x50] sm:$0xff]  ;;  %v250_v8 = vld [vmem:[%s1706_s26 + $0x8] sm:$0xff]  ;;  %s1558_s19 = scalar_lea.hbm %s1557_s18, 1  ;;  %p1563_p0 = scmp.lt.s32.totalorder %s1557_s18, %s2564_s6 }
  0x1b   : > { %v265_v6 = vld [vmem:[%s1706_s26 + $0x80] sm:$0xff]  ;;  %1399 = vmatpush.msra.mxu2 %v274_v3  ;;  %1400 = vmatpush.msra.mxu3 %v274_v3  ;;  %v271_v7 = vld [vmem:[%s1706_s26 + $0xb0] sm:$0xff]  ;;  %v260_v9 = vld [vmem:[%s1706_s26 + $0x58] sm:$0xff]  ;;  %p1559_p11 = scmp.ne.s32.totalorder %s1557_s18, %s1558_s19 }
  0x1c   : > { %1334 = vmatmul.msk.f32.vlgmr.msra.gmra.mxu0 %vm282_vm1, %v249_v4  ;;  %1344 = vmatmul.msk.f32.vlgmr.msra.gmra.mxu1 %vm282_vm1, %v259_v5  ;;  %v266_v10 = vld [vmem:[%s1706_s26 + $0x88] sm:$0xff]  ;;  %v272_v11 = vld [vmem:[%s1706_s26 + $0xb8] sm:$0xff]  ;;  %v251_v12 = vld [vmem:[%s1706_s26 + $0x10] sm:$0xff] }
  0x1d   : > { %1350 = vmatmul.msk.f32.vlgmr.msra.gmra.mxu2 %vm282_vm1, %v265_v6  ;;  %1356 = vmatmul.msk.f32.vlgmr.msra.gmra.mxu3 %vm282_vm1, %v271_v7  ;;  %v261_v13 = vld [vmem:[%s1706_s26 + $0x60] sm:$0xff]  ;;  %v267_v14 = vld [vmem:[%s1706_s26 + $0x90] sm:$0xff]  ;;  %v252_v16 = vld [vmem:[%s1706_s26 + $0x18] sm:$0xff]  ;;  %p1560_p12 = pnand %p1559_p11, %p1679_p5 }
  0x1e   : > { %v273_v15 = vld [vmem:[%s1706_s26 + $0xc0] sm:$0xf]  ;;  %v262_v17 = vld [vmem:[%s1706_s26 + $0x68] sm:$0xff]  ;;  %v268_v18 = vld [vmem:[%s1706_s26 + $0x98] sm:$0xff] }
  0x1f   : > { %v253_v19 = vld [vmem:[%s1706_s26 + $0x20] sm:$0xff]  ;;  %v263_v20 = vld [vmem:[%s1706_s26 + $0x70] sm:$0xff]  ;;  %v254_v22 = vld [vmem:[%s1706_s26 + $0x28] sm:$0xff]  ;;  %p1561_p13 = pneg %p1560_p12 }
  0x20   : > { %v269_v21 = vld [vmem:[%s1706_s26 + $0xa0] sm:$0xff]  ;;  %v264_v23 = vld [vmem:[%s1706_s26 + $0x78] sm:$0xff]  ;;  %v270_v24 = vld [vmem:[%s1706_s26 + $0xa8] sm:$0xff] }
  0x21   : > { %v255_v25 = vld [vmem:[%s1706_s26 + $0x30] sm:$0xff]  ;;  %v256_v26 = vld [vmem:[%s1706_s26 + $0x38] sm:$0xff]  ;;  %v257_v27 = vld [vmem:[%s1706_s26 + $0x40] sm:$0xff] }
  0x22   : > { %v258_v28 = vld [vmem:[%s1706_s26 + $0x48] sm:$0xff]  ;;  %s1562_s26 = scalar_lea.hbm %s2564_s6, 2 }
  0x23   : > { %p1564_p1 = scmp.lt.s32.totalorder %s1562_s26, %s1558_s19 }
  0x24   : > { %1335 = vmatmul.msk.f32.gmra.mxu0 %vm282_vm1, %v250_v8  ;;  %1345 = vmatmul.msk.f32.gmra.mxu1 %vm282_vm1, %v260_v9 }
  0x25   : > { %1351 = vmatmul.msk.f32.gmra.mxu2 %vm282_vm1, %v266_v10  ;;  %1357 = vmatmul.msk.f32.gmra.mxu3 %vm282_vm1, %v272_v11  ;;  %p1565_p2 = por %p1564_p1, %p1563_p0 }
  0x27   : > { %p1566_p3 = pnand %p1565_p2, %p1561_p13 }
  0x2c   : > { %1336 = vmatmul.msk.f32.gmra.mxu0 %vm282_vm1, %v251_v12  ;;  %1346 = vmatmul.msk.f32.gmra.mxu1 %vm282_vm1, %v261_v13 }
  0x2d   : > { %1352 = vmatmul.msk.f32.gmra.mxu2 %vm282_vm1, %v267_v14  ;;  %1358 = vmatmul.msk.f32.gmra.mxu3 %vm282_vm1, %v273_v15 }
  0x34   : > { %1337 = vmatmul.msk.f32.gmra.mxu0 %vm282_vm1, %v252_v16  ;;  %1347 = vmatmul.msk.f32.gmra.mxu1 %vm282_vm1, %v262_v17 }
  0x35   : > { %1353 = vmatmul.msk.f32.gmra.mxu2 %vm282_vm1, %v268_v18 }
  0x3c   : > { %1338 = vmatmul.msk.f32.gmra.mxu0 %vm282_vm1, %v253_v19  ;;  %1348 = vmatmul.msk.f32.gmra.mxu1 %vm282_vm1, %v263_v20 }
  0x3d   : > { %1354 = vmatmul.msk.f32.gmra.mxu2 %vm282_vm1, %v269_v21 }
  0x44   : > { %1339 = vmatmul.msk.f32.gmra.mxu0 %vm282_vm1, %v254_v22  ;;  %1349 = vmatmul.msk.f32.gmra.mxu1 %vm282_vm1, %v264_v23 }
  0x45   : > { %1355 = vmatmul.msk.f32.gmra.mxu2 %vm282_vm1, %v270_v24 }
  0x4c   : > { %1340 = vmatmul.msk.f32.gmra.mxu0 %vm282_vm1, %v255_v25 }
  0x54   : > { %1341 = vmatmul.msk.f32.gmra.mxu0 %vm282_vm1, %v256_v26 }
  0x5c   : > { %1342 = vmatmul.msk.f32.gmra.mxu0 %vm282_vm1, %v257_v27 }
  0x64   : > { %1343 = vmatmul.msk.f32.gmra.mxu0 %vm282_vm1, %v258_v28 }
  0x99   : > { %v379_v30 = vpop.f32.mrf.mxu0  ;;  %v409_v31 = vpop.f32.mrf.mxu1 }
  0x9a   : > { %v1764_v32 = vadd.f32 %v1761_v29, %v379_v30  ;;  %v1767_v33 = vadd.f32 %v1761_v29, %v409_v31 }
  0x9c   : > { %2583 = vst [vmem:[#allocation5_spill] sm:$0xff] %v1764_v32  ;;  %v454_v34 = vsub.f32 0.0, %v1764_v32  ;;  %v464_v35 = vsub.f32 0.0, %v1767_v33 }
  0x9e   : > { %v479_v36 = vmul.f32 1.442695, %v454_v34  ;;  %v499_v37 = vmul.f32 1.442695, %v464_v35 }
  0xa0   : > { %v427_v38 = vpop.f32.mrf.mxu2  ;;  %v445_v39 = vpop.f32.mrf.mxu3  ;;  %1442 = vpow2.f32 %v479_v36 }
  0xa1   : > { %v1772_v40 = vadd.f32 %v1761_v29, %v427_v38  ;;  %v1775_v41 = vadd.f32 %v1761_v29, %v445_v39  ;;  %v382_v42 = vpop.f32.mrf.mxu0  ;;  %v412_v43 = vpop.f32.mrf.mxu1  ;;  %1444 = vpow2.f32 %v499_v37 }
  0xa2   : > { %v1778_v44 = vadd.f32 %v1761_v29, %v382_v42  ;;  %v1781_v45 = vadd.f32 %v1761_v29, %v412_v43 }
  0xa3   : > { %v470_v46 = vsub.f32 0.0, %v1772_v40  ;;  %v476_v47 = vsub.f32 0.0, %v1775_v41 }
  0xa4   : > { %2584 = vst [vmem:[#allocation6_spill] sm:$0xff] %v1778_v44  ;;  %v455_v48 = vsub.f32 0.0, %v1778_v44  ;;  %v465_v49 = vsub.f32 0.0, %v1781_v45 }
  0xa5   : > { %v511_v50 = vmul.f32 1.442695, %v470_v46  ;;  %v523_v51 = vmul.f32 1.442695, %v476_v47 }
  0xa6   : > { %v1443_v52 = vpop.eup %1442  ;;  %v481_v53 = vmul.f32 1.442695, %v455_v48  ;;  %v501_v54 = vmul.f32 1.442695, %v465_v49 }
  0xa7   : > { %1446 = vpow2.f32 %v511_v50  ;;  %v1445_v57 = vpop.eup %1444  ;;  %v1793_v62 = vadd.f32 1.0, %v1443_v52 }
  0xa8   : > { %1448 = vpow2.f32 %v523_v51  ;;  %v430_v55 = vpop.f32.mrf.mxu2  ;;  %v448_v56 = vpop.f32.mrf.mxu3  ;;  %v1803_v3 = vadd.f32 1.0, %v1445_v57 }
  0xa9   : > { %v1788_v58 = vadd.f32 %v1761_v29, %v430_v55  ;;  %v1791_v59 = vadd.f32 %v1761_v29, %v448_v56  ;;  %v385_v60 = vpop.f32.mrf.mxu0  ;;  %v415_v61 = vpop.f32.mrf.mxu1  ;;  %2585 = vst [vmem:[#allocation7_spill] sm:$0xff] %v1793_v62  ;;  %1450 = vpow2.f32 %v481_v53 }
  0xaa   : > { %v1796_v63 = vadd.f32 %v1761_v29, %v385_v60  ;;  %v1799_v0 = vadd.f32 %v1761_v29, %v415_v61  ;;  %1452 = vpow2.f32 %v501_v54 }
  0xab   : > { %v471_v1 = vsub.f32 0.0, %v1788_v58  ;;  %v477_v2 = vsub.f32 0.0, %v1791_v59  ;;  %1454 = vrcp.f32 %v1793_v62 }
  0xac   : > { %2586 = vst [vmem:[#allocation8_spill] sm:$0xff] %v1796_v63  ;;  %v456_v4 = vsub.f32 0.0, %v1796_v63  ;;  %v466_v7 = vsub.f32 0.0, %v1799_v0 }
  0xad   : > { %v1447_v5 = vpop.eup %1446  ;;  %v513_v6 = vmul.f32 1.442695, %v471_v1  ;;  %v525_v9 = vmul.f32 1.442695, %v477_v2 }
  0xae   : > { %v1449_v8 = vpop.eup %1448  ;;  %v483_v11 = vmul.f32 1.442695, %v456_v4  ;;  %v1811_v12 = vadd.f32 1.0, %v1447_v5  ;;  %v503_v16 = vmul.f32 1.442695, %v466_v7 }
  0xaf   : > { %v1808_v10 = vadd.f32 1.0, %v1449_v8  ;;  %1456 = vpow2.f32 %v513_v6  ;;  %v1451_v15 = vpop.eup %1450 }
  0xb0   : > { %1458 = vrcp.f32 %v1803_v3  ;;  %v433_v13 = vpop.f32.mrf.mxu2  ;;  %v451_v14 = vpop.f32.mrf.mxu3  ;;  %v1820_v22 = vadd.f32 1.0, %v1451_v15 }
  0xb1   : > { %1460 = vrcp.f32 %v1808_v10  ;;  %v1815_v17 = vadd.f32 %v1761_v29, %v433_v13  ;;  %v1818_v18 = vadd.f32 %v1761_v29, %v451_v14  ;;  %v388_v19 = vpop.f32.mrf.mxu0  ;;  %v418_v20 = vpop.f32.mrf.mxu1  ;;  %v895_v47 = vand.u32 2147483648, %v1808_v10 }
  0xb2   : > { %v1453_v21 = vpop.eup %1452  ;;  %2587 = vst [vmem:[#allocation9_spill] sm:$0xff] %v1820_v22  ;;  %1462 = vpow2.f32 %v525_v9  ;;  %v1823_v23 = vadd.f32 %v1761_v29, %v388_v19  ;;  %v1826_v24 = vadd.f32 %v1761_v29, %v418_v20  ;;  %vm889_vm2 = vweird.f32 %v1808_v10 }
  0xb3   : > { %1464 = vpow2.f32 %v483_v11  ;;  %v472_v25 = vsub.f32 0.0, %v1815_v17  ;;  %v478_v26 = vsub.f32 0.0, %v1818_v18  ;;  %v1830_v27 = vpop.eup %1454  ;;  %v1833_v28 = vadd.f32 1.0, %v1453_v21 }
  0xb4   : > { %2588 = vst [vmem:[#allocation10_spill] sm:$0xff] %v1823_v23  ;;  %1466 = vrcp.f32 %v1811_v12  ;;  %v457_v30 = vsub.f32 0.0, %v1823_v23  ;;  %v467_v36 = vsub.f32 0.0, %v1826_v24  ;;  %v893_v6 = vand.u32 2147483647, %v1808_v10 }
  0xb5   : > { %2589 = vst [vmem:[#allocation11_spill] sm:$0xff] %v1830_v27  ;;  %v1457_v31 = vpop.eup %1456  ;;  %1468 = vrcp.f32 %v1820_v22  ;;  %v515_v34 = vmul.f32 1.442695, %v472_v25  ;;  %v527_v35 = vmul.f32 1.442695, %v478_v26  ;;  %v1881_v15 = vor.u32 1.1754944e-38, %v895_v47 }
  0xb6   : > { %v1838_v37 = vpop.eup %1458  ;;  %1470 = vpow2.f32 %v503_v16  ;;  %v485_v38 = vmul.f32 1.442695, %v457_v30  ;;  %v1842_v42 = vadd.f32 1.0, %v1457_v31  ;;  %v505_v50 = vmul.f32 1.442695, %v467_v36 }
  0xb7   : > { %v1840_v39 = vpop.eup %1460  ;;  %1472 = vpow2.f32 %v515_v34  ;;  %v1887_v21 = vmul.f32 %v1838_v37, %v1803_v3  ;;  %vm1893_vm5 = vcmp.eq.f32.partialorder %v893_v6, 8.507059e+37 }
  0xb8   : > { %v1463_v43 = vpop.eup %1462  ;;  %1474 = vrcp.f32 %v1833_v28  ;;  %v436_v46 = vpop.f32.mrf.mxu2  ;;  %v885_v1 = vmul.f32 %v1840_v39, %v1808_v10  ;;  %vm890_vm3 = vweird.f32 %v1840_v39 }
  0xb9   : > { %v1465_v48 = vpop.eup %1464  ;;  %v1846_v49 = vadd.f32 1.0, %v1463_v43  ;;  %1476 = vpow2.f32 %v527_v35  ;;  %v1849_v51 = vadd.f32 %v1761_v29, %v436_v46  ;;  %v391_v52 = vpop.f32.mrf.mxu0  ;;  %vm1938_vm7 = vmor %vm889_vm2, %vm890_vm3 }
  0xba   : > { %v421_v53 = vpop.f32.mrf.mxu1  ;;  %v1851_v54 = vpop.eup %1466  ;;  %v1853_v55 = vadd.f32 1.0, %v1465_v48  ;;  %1478 = vpow2.f32 %v485_v38  ;;  %v1856_v56 = vadd.f32 %v1761_v29, %v391_v52  ;;  %v886_v20 = vsub.f32 1.0, %v885_v1 }
  0xbb   : > { %v1859_v57 = vadd.f32 %v1761_v29, %v421_v53  ;;  %v1861_v60 = vpop.eup %1468  ;;  %1480 = vrcp.f32 %v1842_v42  ;;  %v473_v61 = vsub.f32 0.0, %v1849_v51  ;;  %v910_v11 = vand.u32 2147483648, %v1846_v49 }
  0xbc   : > { %2590 = vst [vmem:[#allocation12_spill] sm:$0xff] %v1853_v55  ;;  %v1471_v2 = vpop.eup %1470  ;;  %1482 = vrcp.f32 %v1846_v49  ;;  %v458_v4 = vsub.f32 0.0, %v1856_v56  ;;  %v908_v19 = vand.u32 2147483647, %v1846_v49  ;;  %vm904_vm4 = vweird.f32 %v1846_v49 }
  0xbd   : > { %2591 = vst [vmem:[#allocation13_spill] sm:$0xff] %v1856_v56  ;;  %v468_v5 = vsub.f32 0.0, %v1859_v57  ;;  %v1473_v7 = vpop.eup %1472  ;;  %v1872_v8 = vadd.f32 1.0, %v1471_v2  ;;  %1484 = vpow2.f32 %v505_v50  ;;  %v517_v9 = vmul.f32 1.442695, %v473_v61 }
  0xbe   : > { %2592 = vst [vmem:[#allocation14_spill] sm:$0xff] %v1861_v60  ;;  %v1875_v13 = vpop.eup %1474  ;;  %1486 = vrcp.f32 %v1853_v55  ;;  %v1878_v14 = vadd.f32 1.0, %v1473_v7  ;;  %v487_v30 = vmul.f32 1.442695, %v458_v4  ;;  %v1904_v48 = vor.u32 1.1754944e-38, %v910_v11 }
  0xbf   : > { %v1477_v16 = vpop.eup %1476  ;;  %1488 = vrcp.f32 %v1872_v8  ;;  %v507_v31 = vmul.f32 1.442695, %v468_v5  ;;  %v887_v52 = vmul.f32 %v1840_v39, %v886_v20  ;;  %vm1930_vm6 = vcmp.eq.f32.partialorder %v908_v19, 8.507059e+37 }
  0xc0   : > { %v1479_v25 = vpop.eup %1478  ;;  %1490 = vrcp.f32 %v1878_v14  ;;  %v1890_v26 = vadd.f32 1.0, %v1477_v16  ;;  %v439_v34 = vpop.f32.mrf.mxu2  ;;  %vm739_vm1 = vweird.f32 %v1872_v8 }
  0xc1   : > { %v1897_v36 = vpop.eup %1480  ;;  %v1899_v38 = vadd.f32 1.0, %v1479_v25  ;;  %1492 = vpow2.f32 %v517_v9  ;;  %v1902_v43 = vadd.f32 %v1761_v29, %v439_v34  ;;  %v394_v46 = vpop.f32.mrf.mxu0  ;;  %v888_v19 = vadd.f32 %v1840_v39, %v887_v52 }
  0xc2   : > { %v424_v47 = vpop.f32.mrf.mxu1  ;;  %v1906_v50 = vpop.eup %1482  ;;  %1494 = vrcp.f32 %v1890_v26  ;;  %v1915_v4 = vadd.f32 %v1761_v29, %v394_v46  ;;  %v923_v7 = vand.u32 2147483647, %v1890_v26  ;;  %v925_v9 = vand.u32 2147483648, %v1890_v26 }
  0xc3   : > { %v1485_v1 = vpop.eup %1484  ;;  %1496 = vrcp.f32 %v1899_v38  ;;  %v474_v2 = vsub.f32 0.0, %v1902_v43  ;;  %v1918_v5 = vadd.f32 %v1761_v29, %v424_v47  ;;  %vm919_vm8 = vweird.f32 %v1890_v26 }
  0xc4   : > { %2595 = vst [vmem:[#allocation15_spill] sm:$0xff] %v1915_v4  ;;  %v1920_v6 = vpop.eup %1486  ;;  %v1924_v11 = vadd.f32 1.0, %v1485_v1  ;;  %1498 = vpow2.f32 %v487_v30  ;;  %v459_v25 = vsub.f32 0.0, %v1915_v4  ;;  %v1950_v1 = vmul.f32 %v1875_v13, %v1833_v28 }
  0xc5   : > { %2596 = vst [vmem:[#allocation16_spill] sm:$0xff] %v1920_v6  ;;  %v1926_v16 = vpop.eup %1488  ;;  %1500 = vpow2.f32 %v507_v31  ;;  %v519_v20 = vmul.f32 1.442695, %v474_v2  ;;  %v469_v34 = vsub.f32 0.0, %v1918_v5  ;;  %v900_v31 = vmul.f32 %v1906_v50, %v1846_v49 }
  0xc6   : > { %v1942_v30 = vpop.eup %1490  ;;  %1502 = vrcp.f32 %v1924_v11  ;;  %v489_v10 = vmul.f32 1.442695, %v459_v25  ;;  %vm1953_vm9 = vcmp.eq.f32.partialorder %v923_v7, 8.507059e+37  ;;  %vm905_vm10 = vweird.f32 %v1906_v50 }
  0xc7   : > { %v1493_v2 = vpop.eup %1492  ;;  %1504 = vpow2.f32 %v519_v20  ;;  %v509_v61 = vmul.f32 1.442695, %v469_v34  ;;  %v901_v63 = vsub.f32 1.0, %v900_v31  ;;  %v892_v52 = vsel %vm1938_vm7, %v1840_v39, %v888_v19  ;;  %vm1978_vm13 = vmor %vm904_vm4, %vm905_vm10 }
  0xc8   : > { %v1495_v53 = vpop.eup %1494  ;;  %v442_v44 = vpop.f32.mrf.mxu2  ;;  %v926_v20 = vor.u32 1.1754944e-38, %v925_v9  ;;  %v1964_v25 = vadd.f32 1.0, %v1493_v2  ;;  %1506 = vpow2.f32 %v489_v10  ;;  %v897_v2 = vsel %vm1893_vm5, %v1881_v15, %v892_v52 }
  0xc9   : > { %v1961_v27 = vpop.eup %1496  ;;  %v915_v62 = vmul.f32 %v1495_v53, %v1890_v26  ;;  %v1967_v7 = vadd.f32 %v1761_v29, %v442_v44  ;;  %v397_v34 = vpop.f32.mrf.mxu0  ;;  %vm920_vm11 = vweird.f32 %v1495_v53  ;;  %v902_v39 = vmul.f32 %v1906_v50, %v901_v63 }
  0xca   : > { %2603 = vst [vmem:[#allocation17_spill] sm:$0xff] %v1961_v27  ;;  %v1499_v23 = vpop.eup %1498  ;;  %v1970_v31 = vadd.f32 %v1761_v29, %v397_v34  ;;  %1508 = vpow2.f32 %v509_v61  ;;  %vm754_vm14 = vweird.f32 %v1924_v11  ;;  %vm2000_vm15 = vmor %vm919_vm8, %vm920_vm11  ;;  %vm740_vm10 = vweird.f32 %v1926_v16 }
  0xcb   : > { %v1501_v47 = vpop.eup %1500  ;;  %v916_v19 = vsub.f32 1.0, %v915_v62  ;;  %v475_v9 = vsub.f32 0.0, %v1967_v7  ;;  %v1987_v63 = vadd.f32 1.0, %v1499_v23  ;;  %v903_v34 = vadd.f32 %v1906_v50, %v902_v39 }
  0xcc   : > { %v1985_v10 = vpop.eup %1502  ;;  %v1989_v62 = vadd.f32 1.0, %v1501_v47  ;;  %v460_v61 = vsub.f32 0.0, %v1970_v31  ;;  %1510 = vrcp.f32 %v1964_v25 }
  0xcd   : > { %v1505_v49 = vpop.eup %1504  ;;  %v917_v60 = vmul.f32 %v1495_v53, %v916_v19  ;;  %v521_v22 = vmul.f32 1.442695, %v475_v9  ;;  %v750_v15 = vmul.f32 %v1985_v10, %v1924_v11  ;;  %v907_v39 = vsel %vm1978_vm13, %v1906_v50, %v903_v34  ;;  %vm2112_vm13 = vmor %vm739_vm1, %vm740_vm10 }
  0xce   : > { %1512 = vrcp.f32 %v1989_v62  ;;  %v2005_v35 = vadd.f32 1.0, %v1505_v49  ;;  %v491_v52 = vmul.f32 1.442695, %v460_v61  ;;  %v951_v19 = vmul.f32 %v897_v2, %v1775_v41  ;;  %v1507_v26 = vpop.eup %1506 }
  0xcf   : > { %v918_v47 = vadd.f32 %v1495_v53, %v917_v60  ;;  %1514 = vpow2.f32 %v521_v22  ;;  %v758_v9 = vand.u32 2147483647, %v1924_v11  ;;  %v912_v56 = vsel %vm1930_vm6, %v1904_v48, %v907_v39 }
  0xd0   : > { %1516 = vrcp.f32 %v1987_v63  ;;  %vm769_vm0 = vweird.f32 %v1989_v62  ;;  %v773_v61 = vand.u32 2147483647, %v1989_v62  ;;  %v1509_v49 = vpop.eup %1508  ;;  %v775_v41 = vand.u32 2147483648, %v1989_v62 }
  0xd1   : > { %v922_v60 = vsel %vm2000_vm15, %v1495_v53, %v918_v47  ;;  %1518 = vpow2.f32 %v491_v52  ;;  %v400_v22 = vpop.f32.mrf.mxu0  ;;  %v751_v50 = vsub.f32 1.0, %v750_v15  ;;  %v2024_v46 = vadd.f32 1.0, %v1509_v49 }
  0xd2   : > { %v927_v44 = vsel %vm1953_vm9, %v926_v20, %v922_v60  ;;  %1520 = vrcp.f32 %v2005_v35  ;;  %v2027_v48 = vadd.f32 %v1761_v29, %v400_v22  ;;  %v2030_v2 = vpop.eup %1510  ;;  %v2033_v34 = vadd.f32 1.0, %v1507_v26 }
  0xd3   : > { %v953_v53 = vmul.f32 %v927_v44, %v1818_v18  ;;  %v952_v15 = vmul.f32 %v912_v56, %v1791_v59  ;;  %v752_v32 = vmul.f32 %v1985_v10, %v751_v50  ;;  %1522 = vrcp.f32 %v2024_v46 }
  0xd4   : > { %v1513_v20 = vpop.eup %1512  ;;  %v461_v23 = vsub.f32 0.0, %v2027_v48  ;;  %vm2039_vm2 = vcmp.eq.f32.partialorder %v773_v61, 8.507059e+37  ;;  %v776_v39 = vor.u32 1.1754944e-38, %v775_v41  ;;  %v788_v18 = vand.u32 2147483647, %v2024_v46 }
  0xd5   : > { %v1515_v47 = vpop.eup %1514  ;;  %1359 = vmatpush.msk.msrb.mxu2 %vm965_vm12, %v953_v53  ;;  %v790_v26 = vand.u32 2147483648, %v2024_v46  ;;  %v765_v59 = vmul.f32 %v1513_v20, %v1989_v62  ;;  %v753_v56 = vadd.f32 %v1985_v10, %v752_v32  ;;  %vm784_vm3 = vweird.f32 %v2024_v46 }
  0xd6   : > { %v2048_v49 = vpop.eup %1516  ;;  %v2050_v60 = vadd.f32 1.0, %v1515_v47  ;;  %v493_v61 = vmul.f32 1.442695, %v461_v23  ;;  %vm755_vm4 = vweird.f32 %v1985_v10  ;;  %vm770_vm5 = vweird.f32 %v1513_v20 }
  0xd7   : > { %v1519_v22 = vpop.eup %1518  ;;  %1000 = vmatpush.msrb.mxu2 %v952_v15  ;;  %v2054_v41 = vor.u32 1.1754944e-38, %v790_v26  ;;  %v766_v50 = vsub.f32 1.0, %v765_v59  ;;  %vm2058_vm6 = vmor %vm754_vm14, %vm755_vm4  ;;  %v760_v53 = vand.u32 2147483648, %v1924_v11  ;;  %vm2069_vm7 = vcmp.eq.f32.partialorder %v758_v9, 8.507059e+37 }
  0xd8   : > { %v2063_v32 = vpop.eup %1520  ;;  %1524 = vrcp.f32 %v2050_v60  ;;  %v757_v15 = vsel %vm2058_vm6, %v1985_v10, %v753_v56  ;;  %v735_v47 = vmul.f32 %v1926_v16, %v1872_v8  ;;  %v2075_v26 = vadd.f32 1.0, %v1519_v22  ;;  %vm2087_vm9 = vmor %vm769_vm0, %vm770_vm5 }
  0xd9   : > { %1526 = vpow2.f32 %v493_v61  ;;  %1001 = vmatpush.msrb.mxu2 %v951_v19  ;;  %v403_v11 = vpop.f32.mrf.mxu0  ;;  %vm2077_vm8 = vcmp.eq.f32.partialorder %v788_v18, 8.507059e+37  ;;  %v767_v6 = vmul.f32 %v1513_v20, %v766_v50  ;;  %v761_v55 = vor.u32 1.1754944e-38, %v760_v53  ;;  %v1523_v44 = vpop.eup %1522 }
  0xda   : > { %v2082_v10 = vadd.f32 %v1761_v29, %v403_v11  ;;  %v736_v56 = vsub.f32 1.0, %v735_v47  ;;  %v2618_v19 = vand.u32 2147483647, %v1872_v8  ;;  %v780_v61 = vmul.f32 %v1523_v44, %v2024_v46 }
  0xdb   : > { %vm785_vm12 = vweird.f32 %v1523_v44  ;;  %v768_v22 = vadd.f32 %v1513_v20, %v767_v6  ;;  %v762_v62 = vsel %vm2069_vm7, %v761_v55, %v757_v15  ;;  %v2621_v11 = vand.u32 2147483648, %v1872_v8 }
  0xdc   : > { %vm2094_vm11 = vcmp.eq.f32.partialorder %v2618_v19, 8.507059e+37  ;;  %v462_v50 = vsub.f32 0.0, %v2082_v10  ;;  %v2103_v53 = vmul.f32 %v762_v62, %v1826_v24  ;;  %v737_v47 = vmul.f32 %v1926_v16, %v736_v56  ;;  %vm2129_vm0 = vmor %vm784_vm3, %vm785_vm12 }
  0xdd   : > { %v746_v19 = vor.u32 1.1754944e-38, %v2621_v11  ;;  %v781_v4 = vsub.f32 1.0, %v780_v61  ;;  %v772_v27 = vsel %vm2087_vm9, %v1513_v20, %v768_v22  ;;  %vm874_vm14 = vweird.f32 %v2050_v60 }
  0xde   : > { %v878_v24 = vand.u32 2147483647, %v2050_v60  ;;  %v1525_v55 = vpop.eup %1524  ;;  %v495_v15 = vmul.f32 1.442695, %v462_v50  ;;  %v777_v23 = vsel %vm2039_vm2, %v776_v39, %v772_v27  ;;  %v738_v56 = vadd.f32 %v1926_v16, %v737_v47 }
  0xdf   : > { %v880_v9 = vand.u32 2147483648, %v2050_v60  ;;  %v1527_v20 = vpop.eup %1526  ;;  %v782_v61 = vmul.f32 %v1523_v44, %v781_v4  ;;  %v943_v8 = vmul.f32 %v777_v23, %v1859_v57  ;;  %v870_v22 = vmul.f32 %v1525_v55, %v2050_v60 }
  0xe0   : > { %vm875_vm15 = vweird.f32 %v1525_v55  ;;  %v2124_v62 = vadd.f32 1.0, %v1527_v20  ;;  %1528 = vpow2.f32 %v495_v15  ;;  %v742_v27 = vsel %vm2112_vm13, %v1926_v16, %v738_v56 }
  0xe1   : > { %vm2136_vm1 = vcmp.eq.f32.partialorder %v878_v24, 8.507059e+37  ;;  %v406_v57 = vpop.f32.mrf.mxu0  ;;  %v783_v39 = vadd.f32 %v1523_v44, %v782_v61  ;;  %v747_v50 = vsel %vm2094_vm11, %v746_v19, %v742_v27  ;;  %v871_v47 = vsub.f32 1.0, %v870_v22  ;;  %vm2159_vm4 = vmor %vm874_vm14, %vm875_vm15 }
  0xe2   : > { %v881_v11 = vor.u32 1.1754944e-38, %v880_v9  ;;  %1530 = vrcp.f32 %v2124_v62  ;;  %v2144_v46 = vadd.f32 %v1761_v29, %v406_v57  ;;  %v941_v15 = vmul.f32 %v747_v50, %v1799_v0 }
  0xe3   : > { %v721_v16 = vsub.f32 1.0, %v1950_v1  ;;  %v787_v6 = vsel %vm2129_vm0, %v1523_v44, %v783_v39  ;;  %v872_v24 = vmul.f32 %v1525_v55, %v871_v47  ;;  %vm724_vm2 = vweird.f32 %v1833_v28 }
  0xe4   : > { %vm725_vm3 = vweird.f32 %v1875_v13  ;;  %v463_v18 = vsub.f32 0.0, %v2144_v46  ;;  %v792_v19 = vsel %vm2077_vm8, %v2054_v41, %v787_v6  ;;  %v728_v1 = vand.u32 2147483647, %v1833_v28 }
  0xe5   : > { %v722_v0 = vmul.f32 %v1875_v13, %v721_v16  ;;  %v944_v44 = vmul.f32 %v792_v19, %v1918_v5  ;;  %v873_v23 = vadd.f32 %v1525_v55, %v872_v24  ;;  %vm2166_vm5 = vmor %vm724_vm2, %vm725_vm3  ;;  %v730_v41 = vand.u32 2147483648, %v1833_v28 }
  0xe6   : > { %v855_v60 = vmul.f32 %v2063_v32, %v2005_v35  ;;  %v1529_v59 = vpop.eup %1528  ;;  %v497_v9 = vmul.f32 1.442695, %v463_v18  ;;  %vm729_vm6 = vcmp.eq.f32.partialorder %v728_v1, 8.507059e+37  ;;  %vm859_vm7 = vweird.f32 %v2005_v35 }
  0xe7   : > { %v723_v20 = vadd.f32 %v1875_v13, %v722_v0  ;;  %v2175_v61 = vadd.f32 1.0, %v1529_v59  ;;  %969 = vmatpush.msrb.mxu1 %v944_v44  ;;  %v877_v5 = vsel %vm2159_vm4, %v1525_v55, %v873_v23  ;;  %v731_v22 = vor.u32 1.1754944e-38, %v730_v41 }
  0xe8   : > { %v856_v52 = vsub.f32 1.0, %v855_v60  ;;  %v2179_v27 = vpop.eup %1530  ;;  %1532 = vpow2.f32 %v497_v9  ;;  %v882_v28 = vsel %vm2136_vm1, %v881_v11, %v877_v5  ;;  %vm860_vm8 = vweird.f32 %v2063_v32 }
  0xe9   : > { %v727_v57 = vsel %vm2166_vm5, %v1875_v13, %v723_v20  ;;  %1534 = vrcp.f32 %v2175_v61  ;;  %970 = vmatpush.msrb.mxu1 %v943_v8  ;;  %v950_v39 = vmul.f32 %v882_v28, %v1967_v7  ;;  %vm2193_vm9 = vmor %vm859_vm7, %vm860_vm8  ;;  %v863_v13 = vand.u32 2147483647, %v2005_v35 }
  0xea   : > { %v732_v55 = vsel %vm729_vm6, %v731_v22, %v727_v57  ;;  %v857_v50 = vmul.f32 %v2063_v32, %v856_v52  ;;  %v865_v11 = vand.u32 2147483648, %v2005_v35  ;;  %v706_v16 = vsub.f32 1.0, %v1887_v21 }
  0xeb   : > { %v940_v47 = vmul.f32 %v732_v55, %v1781_v45  ;;  %971 = vmatpush.msrb.mxu1 %v2103_v53  ;;  %1002 = vmatpush.msrb.mxu2 %v950_v39  ;;  %vm709_vm10 = vweird.f32 %v1803_v3  ;;  %vm710_vm11 = vweird.f32 %v1838_v37  ;;  %v713_v45 = vand.u32 2147483647, %v1803_v3 }
  0xec   : > { %v858_v7 = vadd.f32 %v2063_v32, %v857_v50  ;;  %vm864_vm12 = vcmp.eq.f32.partialorder %v863_v13, 8.507059e+37  ;;  %v866_v8 = vor.u32 1.1754944e-38, %v865_v11  ;;  %v707_v6 = vmul.f32 %v1838_v37, %v706_v16  ;;  %vm2210_vm13 = vmor %vm709_vm10, %vm710_vm11 }
  0xed   : > { %v715_v24 = vand.u32 2147483648, %v1803_v3  ;;  %972 = vmatpush.msrb.mxu1 %v941_v15  ;;  %vm2214_vm14 = vcmp.eq.f32.partialorder %v713_v45, 8.507059e+37  ;;  %v840_v18 = vmul.f32 %v2030_v2, %v1964_v25  ;;  %vm844_vm15 = vweird.f32 %v1964_v25 }
  0xee   : > { %v862_v21 = vsel %vm2193_vm9, %v2063_v32, %v858_v7  ;;  %v1533_v19 = vpop.eup %1532  ;;  %v708_v15 = vadd.f32 %v1838_v37, %v707_v6  ;;  %vm845_vm0 = vweird.f32 %v2030_v2  ;;  %v848_v23 = vand.u32 2147483647, %v1964_v25 }
  0xef   : > { %v867_v3 = vsel %vm864_vm12, %v866_v8, %v862_v21  ;;  %v716_v29 = vor.u32 1.1754944e-38, %v715_v24  ;;  %v2223_v32 = vpop.eup %1534  ;;  %v2225_v0 = vadd.f32 1.0, %v1533_v19  ;;  %973 = vmatpush.msrb.mxu1 %v940_v47  ;;  %v841_v44 = vsub.f32 1.0, %v840_v18  ;;  %vm2249_vm3 = vmor %vm844_vm15, %vm845_vm0 }
  0xf0   : > { %v949_v1 = vmul.f32 %v867_v3, %v1902_v43  ;;  %v712_v56 = vsel %vm2210_vm13, %v1838_v37, %v708_v15  ;;  %v850_v41 = vand.u32 2147483648, %v1964_v25  ;;  %v825_v60 = vmul.f32 %v1942_v30, %v1878_v14 }
  0xf1   : > { %vm829_vm1 = vweird.f32 %v1878_v14  ;;  %1536 = vrcp.f32 %v2225_v0  ;;  %v717_v43 = vsel %vm2214_vm14, %v716_v29, %v712_v56  ;;  %v842_v59 = vmul.f32 %v2030_v2, %v841_v44 }
  0xf2   : > { %1003 = vmatpush.msrb.mxu2 %v949_v1  ;;  %vm2240_vm2 = vcmp.eq.f32.partialorder %v848_v23, 8.507059e+37  ;;  %v939_v37 = vmul.f32 %v717_v43, %v1767_v33  ;;  %v851_v5 = vor.u32 1.1754944e-38, %v850_v41  ;;  %v826_v22 = vsub.f32 1.0, %v825_v60 }
  0xf3   : > { %vm830_vm4 = vweird.f32 %v1942_v30  ;;  %v843_v52 = vadd.f32 %v2030_v2, %v842_v59  ;;  %v833_v28 = vand.u32 2147483647, %v1878_v14  ;;  %v835_v57 = vand.u32 2147483648, %v1878_v14 }
  0xf4   : > { %v810_v33 = vmul.f32 %v1897_v36, %v1842_v42  ;;  %974 = vmatpush.msrb.mxu1 %v939_v37  ;;  %v827_v25 = vmul.f32 %v1942_v30, %v826_v22  ;;  %vm814_vm5 = vweird.f32 %v1842_v42  ;;  %vm815_vm6 = vweird.f32 %v1897_v36  ;;  %vm2268_vm7 = vmor %vm829_vm1, %vm830_vm4 }
  0xf5   : > { %v818_v39 = vand.u32 2147483647, %v1842_v42  ;;  %v847_v55 = vsel %vm2249_vm3, %v2030_v2, %v843_v52  ;;  %vm2272_vm8 = vcmp.eq.f32.partialorder %v833_v28, 8.507059e+37  ;;  %v836_v4 = vor.u32 1.1754944e-38, %v835_v57  ;;  %vm2296_vm11 = vmor %vm814_vm5, %vm815_vm6 }
  0xf6   : > { %v811_v13 = vsub.f32 1.0, %v810_v33  ;;  %v852_v11 = vsel %vm2240_vm2, %v851_v5, %v847_v55  ;;  %v828_v16 = vadd.f32 %v1942_v30, %v827_v25  ;;  %v820_v14 = vand.u32 2147483648, %v1842_v42 }
  0xf7   : > { %vm2279_vm9 = vcmp.eq.f32.partialorder %v818_v39, 8.507059e+37  ;;  %v1537_v2 = vpop.eup %1536  ;;  %v948_v45 = vmul.f32 %v852_v11, %v1849_v51  ;;  %v795_v6 = vmul.f32 %v1851_v54, %v1811_v12  ;;  %vm799_vm10 = vweird.f32 %v1811_v12 }
  0xf8   : > { %v812_v8 = vmul.f32 %v1897_v36, %v811_v13  ;;  %v832_v24 = vsel %vm2268_vm7, %v1942_v30, %v828_v16  ;;  %v821_v51 = vor.u32 1.1754944e-38, %v820_v14  ;;  %vm800_vm12 = vweird.f32 %v1851_v54 }
  0xf9   : > { %v803_v35 = vand.u32 2147483647, %v1811_v12  ;;  %1004 = vmatpush.msrb.mxu2 %v948_v45  ;;  %v837_v53 = vsel %vm2272_vm8, %v836_v4, %v832_v24  ;;  %v796_v30 = vsub.f32 1.0, %v795_v6  ;;  %v805_v19 = vand.u32 2147483648, %v1811_v12  ;;  %vm2320_vm13 = vmor %vm799_vm10, %vm800_vm12 }
  0xfa   : > { %v813_v18 = vadd.f32 %v1897_v36, %v812_v8  ;;  %1538 = vrcp.f32 %v2075_v26  ;;  %v947_v42 = vmul.f32 %v837_v53, %v1815_v17  ;;  %v690_v3 = vmul.f32 %v1537_v2, %v2225_v0  ;;  %v2656_v17 = vld [vmem:[#allocation17_spill] sm:$0xff] }
  0xfb   : > { %1540 = vrcp.f32 %v2033_v34  ;;  %v797_v29 = vmul.f32 %v1851_v54, %v796_v30  ;;  %v806_v1 = vor.u32 1.1754944e-38, %v805_v19  ;;  %v698_v56 = vand.u32 2147483647, %v2225_v0 }
  0xfc   : > { %v817_v15 = vsel %vm2296_vm11, %v1897_v36, %v813_v18  ;;  %1005 = vmatpush.msrb.mxu2 %v947_v42  ;;  %v691_v23 = vsub.f32 1.0, %v690_v3  ;;  %v700_v36 = vand.u32 2147483648, %v2225_v0  ;;  %vm804_vm14 = vcmp.eq.f32.partialorder %v803_v35, 8.507059e+37 }
  0xfd   : > { %v822_v44 = vsel %vm2279_vm9, %v821_v51, %v817_v15  ;;  %v798_v60 = vadd.f32 %v1851_v54, %v797_v29  ;;  %v675_v43 = vmul.f32 %v2223_v32, %v2175_v61  ;;  %vm694_vm15 = vweird.f32 %v2225_v0  ;;  %v1363_v15 = vld [vmem:[%s2562_s4 + $0x18] sm:$0xff] }
  0xfe   : > { %v946_v41 = vmul.f32 %v822_v44, %v1788_v58  ;;  %v692_v59 = vmul.f32 %v1537_v2, %v691_v23  ;;  %vm695_vm0 = vweird.f32 %v1537_v2  ;;  %vm679_vm1 = vweird.f32 %v2175_v61  ;;  %1039 = vmatpush.msrb.mxu3 %v1363_v15 }
  0xff   : > { %v802_v12 = vsel %vm2320_vm13, %v1851_v54, %v798_v60  ;;  %vm2335_vm2 = vcmp.eq.f32.partialorder %v698_v56, 8.507059e+37  ;;  %v676_v58 = vsub.f32 1.0, %v675_v43  ;;  %v685_v37 = vand.u32 2147483648, %v2175_v61  ;;  %vm696_vm3 = vmor %vm694_vm15, %vm695_vm0 }
 0x100   : > { %1006 = vmatpush.msrb.mxu2 %v946_v41  ;;  %v1539_v20 = vpop.eup %1538  ;;  %v807_v5 = vsel %vm804_vm14, %v806_v1, %v802_v12  ;;  %v693_v22 = vadd.f32 %v1537_v2, %v692_v59  ;;  %v701_v52 = vor.u32 1.1754944e-38, %v700_v36  ;;  %v660_v28 = vmul.f32 %v2179_v27, %v2124_v62 }
 0x101   : > { %v2342_v57 = vpop.eup %1540  ;;  %v945_v33 = vmul.f32 %v807_v5, %v1772_v40  ;;  %v677_v54 = vmul.f32 %v2223_v32, %v676_v58  ;;  %vm680_vm4 = vweird.f32 %v2223_v32  ;;  %v683_v25 = vand.u32 2147483647, %v2175_v61  ;;  %v2657_v58 = vld [vmem:[#allocation15_spill] sm:$0xff] }
 0x102   : > { %v697_v39 = vsel %vm696_vm3, %v1537_v2, %v693_v22  ;;  %v686_v55 = vor.u32 1.1754944e-38, %v685_v37  ;;  %v661_v50 = vsub.f32 1.0, %v660_v28  ;;  %vm664_vm5 = vweird.f32 %v2124_v62  ;;  %vm681_vm6 = vmor %vm679_vm1, %vm680_vm4  ;;  %v2658_v22 = vld [vmem:[#allocation12_spill] sm:$0xff] }
 0x103   : > { %1007 = vmatpush.msrb.mxu2 %v945_v33  ;;  %v702_v47 = vsel %vm2335_vm2, %v701_v52, %v697_v39  ;;  %v678_v40 = vadd.f32 %v2223_v32, %v677_v54  ;;  %v670_v0 = vand.u32 2147483648, %v2124_v62  ;;  %v645_v4 = vmul.f32 %v1539_v20, %v2075_v26  ;;  %v2659_v52 = vld [vmem:[#allocation16_spill] sm:$0xff] }
 0x104   : > { %v938_v13 = vmul.f32 %v702_v47, %v2144_v46  ;;  %v662_v11 = vmul.f32 %v2179_v27, %v661_v50  ;;  %vm665_vm7 = vweird.f32 %v2179_v27  ;;  %v668_v16 = vand.u32 2147483647, %v2124_v62  ;;  %v2661_v47 = vld [vmem:[#allocation9_spill] sm:$0xff] }
 0x105   : > { %v682_v7 = vsel %vm681_vm6, %v2223_v32, %v678_v40  ;;  %vm684_vm8 = vcmp.eq.f32.partialorder %v683_v25, 8.507059e+37  ;;  %v671_v14 = vor.u32 1.1754944e-38, %v670_v0  ;;  %v646_v2 = vsub.f32 1.0, %v645_v4  ;;  %vm666_vm10 = vmor %vm664_vm5, %vm665_vm7  ;;  %v2660_v25 = vld [vmem:[#allocation13_spill] sm:$0xff]  ;;  %v2662_v40 = vld [vmem:[#allocation14_spill] sm:$0xff] }
 0x106   : > { %975 = vmatpush.msrb.mxu1 %v938_v13  ;;  %v687_v45 = vsel %vm684_vm8, %v686_v55, %v682_v7  ;;  %v663_v8 = vadd.f32 %v2179_v27, %v662_v11  ;;  %vm650_vm9 = vweird.f32 %v1539_v20  ;;  %v655_v46 = vand.u32 2147483648, %v2075_v26  ;;  %v2663_v7 = vld [vmem:[#allocation10_spill] sm:$0xff] }
 0x107   : > { %v937_v61 = vmul.f32 %v687_v45, %v2082_v10  ;;  %v647_v6 = vmul.f32 %v1539_v20, %v646_v2  ;;  %v653_v24 = vand.u32 2147483647, %v2075_v26  ;;  %v630_v32 = vmul.f32 %v2342_v57, %v2033_v34 }
 0x108   : > { %v667_v21 = vsel %vm666_vm10, %v2179_v27, %v663_v8  ;;  %vm669_vm11 = vcmp.eq.f32.partialorder %v668_v16, 8.507059e+37  ;;  %vm649_vm12 = vweird.f32 %v2075_v26  ;;  %vm634_vm13 = vweird.f32 %v2033_v34  ;;  %v957_v16 = vld [vmem:[%s2561_s3 + $0x18] sm:$0x1] }
 0x109   : > { %976 = vmatpush.msrb.mxu1 %v937_v61  ;;  %v672_v51 = vsel %vm669_vm11, %v671_v14, %v667_v21  ;;  %v648_v35 = vadd.f32 %v1539_v20, %v647_v6  ;;  %v631_v10 = vsub.f32 1.0, %v630_v32  ;;  %v638_v62 = vand.u32 2147483647, %v2033_v34  ;;  %vm651_vm14 = vmor %vm649_vm12, %vm650_vm9  ;;  %v2664_v8 = vld [vmem:[#allocation7_spill] sm:$0xff] }
 0x10a   : > { %v936_v53 = vmul.f32 %v672_v51, %v2027_v48  ;;  %v656_v18 = vor.u32 1.1754944e-38, %v655_v46  ;;  %v640_v30 = vand.u32 2147483648, %v2033_v34  ;;  %v615_v27 = vmul.f32 %v2048_v49, %v1987_v63  ;;  %v2665_v46 = vld [vmem:[#allocation11_spill] sm:$0xff] }
 0x10b   : > { %v652_v19 = vsel %vm651_vm14, %v1539_v20, %v648_v35  ;;  %vm654_vm15 = vcmp.eq.f32.partialorder %v653_v24, 8.507059e+37  ;;  %v632_v26 = vmul.f32 %v2342_v57, %v631_v10  ;;  %vm635_vm0 = vweird.f32 %v2342_v57 }
 0x10c   : > { %977 = vmatpush.msrb.mxu1 %v936_v53  ;;  %v657_v42 = vsel %vm654_vm15, %v656_v18, %v652_v19  ;;  %vm2382_vm1 = vcmp.eq.f32.partialorder %v638_v62, 8.507059e+37  ;;  %v616_v48 = vsub.f32 1.0, %v615_v27  ;;  %vm619_vm2 = vweird.f32 %v1987_v63  ;;  %vm636_vm3 = vmor %vm634_vm13, %vm635_vm0  ;;  %v2666_v53 = vld [vmem:[#allocation8_spill] sm:$0xff] }
 0x10d   : > { %v935_v29 = vmul.f32 %v657_v42, %v1970_v31  ;;  %v633_v1 = vadd.f32 %v2342_v57, %v632_v26  ;;  %v625_v44 = vand.u32 2147483648, %v1987_v63  ;;  %v600_v23 = vmul.f32 %v2656_v17, %v1899_v38  ;;  %v955_v31 = vld [vmem:[%s2561_s3 + $0x8] sm:$0xff] }
 0x10e   : > { %v641_v56 = vor.u32 1.1754944e-38, %v640_v30  ;;  %v617_v36 = vmul.f32 %v2048_v49, %v616_v48  ;;  %vm620_vm4 = vweird.f32 %v2048_v49  ;;  %v623_v41 = vand.u32 2147483647, %v1987_v63  ;;  %v2667_v48 = vld [vmem:[#allocation6_spill] sm:$0xff] }
 0x10f   : > { %978 = vmatpush.msrb.mxu1 %v935_v29  ;;  %v637_v60 = vsel %vm636_vm3, %v2342_v57, %v633_v1  ;;  %v601_v43 = vsub.f32 1.0, %v600_v23  ;;  %vm605_vm5 = vweird.f32 %v2656_v17  ;;  %v608_v34 = vand.u32 2147483647, %v1899_v38  ;;  %vm621_vm7 = vmor %vm619_vm2, %vm620_vm4 }
 0x110   : > { %v642_v59 = vsel %vm2382_vm1, %v641_v56, %v637_v60  ;;  %v618_v12 = vadd.f32 %v2048_v49, %v617_v36  ;;  %v610_v9 = vand.u32 2147483648, %v1899_v38  ;;  %vm958_vm6 = vcmask 556032   ;;  %v954_v56 = vld [vmem:[%s2561_s3] sm:$0xff]  ;;  %v956_v36 = vld [vmem:[%s2561_s3 + $0x10] sm:$0x1] }
 0x111   : > { %v934_v37 = vmul.f32 %v642_v59, %v2657_v58  ;;  %v626_v20 = vor.u32 1.1754944e-38, %v625_v44  ;;  %v602_v5 = vmul.f32 %v2656_v17, %v601_v43  ;;  %1360 = vmatmul.msk.f32.vlgmr.msrb.gmra.mxu2 %vm958_vm6, %v955_v31  ;;  %v585_v28 = vmul.f32 %v2659_v52, %v2658_v22  ;;  %v1373_v31 = vld [vmem:[%s2562_s4 + $0x48] sm:$0xff]  ;;  %v1372_v60 = vld [vmem:[%s2562_s4 + $0x40] sm:$0xff] }
 0x112   : > { %v622_v57 = vsel %vm621_vm7, %v2048_v49, %v618_v12  ;;  %vm624_vm8 = vcmp.eq.f32.partialorder %v623_v41, 8.507059e+37  ;;  %vm604_vm9 = vweird.f32 %v1899_v38  ;;  %vm609_vm10 = vcmp.eq.f32.partialorder %v608_v34, 8.507059e+37  ;;  %v1362_v41 = vld [vmem:[%s2562_s4 + $0x10] sm:$0xff]  ;;  %v1016_v43 = vld [vmem:[%s2562_s4 + $0x8] sm:$0xff]  ;;  %1141 = vmatpush.msra.mxu2 %v1373_v31  ;;  %v1015_v34 = vld [vmem:[%s2562_s4] sm:$0xff] }
 0x113   : > { %979 = vmatpush.msrb.mxu1 %v934_v37  ;;  %v627_v33 = vsel %vm624_vm8, %v626_v20, %v622_v57  ;;  %v603_v54 = vadd.f32 %v2656_v17, %v602_v5  ;;  %v586_v63 = vsub.f32 1.0, %v585_v28  ;;  %vm606_vm11 = vmor %vm604_vm9, %vm605_vm5  ;;  %v611_v55 = vor.u32 1.1754944e-38, %v610_v9  ;;  %1040 = vmatpush.msrb.mxu3 %v1362_v41  ;;  %v1379_v59 = vld [vmem:[%s2562_s4 + $0x68] sm:$0xff]  ;;  %v1378_v12 = vld [vmem:[%s2562_s4 + $0x60] sm:$0xff] }
 0x114   : > { %v933_v39 = vmul.f32 %v627_v33, %v2660_v25  ;;  %v595_v50 = vand.u32 2147483648, %v2658_v22  ;;  %v570_v49 = vmul.f32 %v2662_v40, %v2661_v47  ;;  %vm590_vm12 = vweird.f32 %v2659_v52  ;;  %1142 = vmatpush.msra.mxu2 %v1372_v60  ;;  %v1370_v57 = vld [vmem:[%s2562_s4 + $0x38] sm:$0xff]  ;;  %v1369_v33 = vld [vmem:[%s2562_s4 + $0x30] sm:$0xff] }
 0x115   : > { %v607_v0 = vsel %vm606_vm11, %v2656_v17, %v603_v54  ;;  %v587_v38 = vmul.f32 %v2659_v52, %v586_v63  ;;  %v593_v4 = vand.u32 2147483647, %v2658_v22  ;;  %vm589_vm13 = vweird.f32 %v2658_v22  ;;  %v2668_v17 = vld [vmem:[#allocation5_spill] sm:$0xff]  ;;  %1061 = vmatpush.msra.mxu3 %v1016_v43 }
 0x116   : > { %980 = vmatpush.msrb.mxu1 %v933_v39  ;;  %v612_v13 = vsel %vm609_vm10, %v611_v55, %v607_v0  ;;  %v571_v11 = vsub.f32 1.0, %v570_v49  ;;  %v580_v45 = vand.u32 2147483648, %v2661_v47  ;;  %v555_v61 = vmul.f32 %v2665_v46, %v2664_v8  ;;  %vm591_vm14 = vmor %vm589_vm13, %vm590_vm12  ;;  %1195 = vmatpush.msrb.mxu2 %v1379_v59  ;;  %v1367_v22 = vld [vmem:[%s2562_s4 + $0x28] sm:$0xff]  ;;  %v1384_v39 = vld [vmem:[%s2562_s4 + $0x80] sm:$0xff] }
 0x117   : > { %v932_v14 = vmul.f32 %v612_v13, %v2663_v7  ;;  %v588_v2 = vadd.f32 %v2659_v52, %v587_v38  ;;  %v596_v6 = vor.u32 1.1754944e-38, %v595_v50  ;;  %vm575_vm15 = vweird.f32 %v2662_v40  ;;  %1062 = vmatpush.msra.mxu3 %v1015_v34  ;;  %v1385_v54 = vld [vmem:[%s2562_s4 + $0x88] sm:$0xff]  ;;  %v1382_v0 = vld [vmem:[%s2562_s4 + $0x78] sm:$0xff]  ;;  %v1381_v38 = vld [vmem:[%s2562_s4 + $0x70] sm:$0xff] }
 0x118   : > { %v572_v24 = vmul.f32 %v2662_v40, %v571_v11  ;;  %v578_v32 = vand.u32 2147483647, %v2661_v47  ;;  %vm594_vm0 = vcmp.eq.f32.partialorder %v593_v4, 8.507059e+37  ;;  %vm574_vm1 = vweird.f32 %v2661_v47  ;;  %1196 = vmatpush.msrb.mxu2 %v1378_v12  ;;  %v1376_v47 = vld [vmem:[%s2562_s4 + $0x58] sm:$0xff] }
 0x119   : > { %981 = vmatpush.msrb.mxu1 %v932_v14  ;;  %v592_v21 = vsel %vm591_vm14, %v2659_v52, %v588_v2  ;;  %v556_v51 = vsub.f32 1.0, %v555_v61  ;;  %1361 = vmatmul.msk.f32.gmra.mxu2 %vm958_vm6, %v957_v16  ;;  %vm560_vm2 = vweird.f32 %v2665_v46  ;;  %v565_v62 = vand.u32 2147483648, %v2664_v8  ;;  %vm576_vm3 = vmor %vm574_vm1, %vm575_vm15  ;;  %v1366_v52 = vld [vmem:[%s2562_s4 + $0x20] sm:$0xff] }
 0x11a   : > { %v597_v35 = vsel %vm594_vm0, %v596_v6, %v592_v21  ;;  %v573_v10 = vadd.f32 %v2662_v40, %v572_v24  ;;  %v581_v30 = vor.u32 1.1754944e-38, %v580_v45  ;;  %v563_v19 = vand.u32 2147483647, %v2664_v8 }
 0x11b   : > { %v931_v18 = vmul.f32 %v597_v35, %v2666_v53  ;;  %v557_v27 = vmul.f32 %v2665_v46, %v556_v51  ;;  %vm579_vm4 = vcmp.eq.f32.partialorder %v578_v32, 8.507059e+37  ;;  %vm559_vm5 = vweird.f32 %v2664_v8  ;;  %v1257_v53 = vld [vmem:[%s2563_s5] sm:$0x1] }
 0x11c   : > { %v577_v26 = vsel %vm576_vm3, %v2662_v40, %v573_v10  ;;  %vm561_vm6 = vmor %vm559_vm5, %vm560_vm2  ;;  %v566_v29 = vor.u32 1.1754944e-38, %v565_v62  ;;  %vm564_vm7 = vcmp.eq.f32.partialorder %v563_v19, 8.507059e+37  ;;  %vm1022_vm8 = vcmask 130048   ;;  %v1375_v40 = vld [vmem:[%s2562_s4 + $0x50] sm:$0xff] }
 0x11d   : > { %982 = vmatpush.msrb.mxu1 %v931_v18  ;;  %v582_v42 = vsel %vm579_vm4, %v581_v30, %v577_v26  ;;  %v558_v3 = vadd.f32 %v2665_v46, %v557_v27 }
 0x11e   : > { %v930_v15 = vmul.f32 %v582_v42, %v2667_v48 }
 0x11f   : > { %v562_v1 = vsel %vm561_vm6, %v2665_v46, %v558_v3 }
 0x120   : > { %983 = vmatpush.msrb.mxu1 %v930_v15  ;;  %v567_v44 = vsel %vm564_vm7, %v566_v29, %v562_v1 }
 0x121   : > { %v929_v23 = vmul.f32 %v567_v44, %v2668_v17 }
 0x123   : > { %984 = vmatpush.msrb.mxu1 %v929_v23 }
 0x124   : > { %985 = vmatmul.f32.vlgmr.msrb.gmra.mxu1 %v954_v56 }
 0x125   : > { %1249 = vmatpush.msra.mxu1 %v1385_v54 }
 0x127   : > { %1250 = vmatpush.msra.mxu1 %v1384_v39 }
 0x12c   : > { %988 = vmatmul.f32.gmra.mxu1 %v956_v36 }
 0x194   : > { %v1009_v9 = vpop.f32.mrf.mxu2 }
 0x19c   : > { %v1012_v25 = vpop.f32.mrf.mxu2 }
 0x1a1   : > { %v986_v58 = vpop.f32.mrf.mxu1 }
 0x1a2   : > { %v1010_v37 = vadd.f32 %v1009_v9, %v986_v58 }
 0x1a4   : > { %v1021_v20 = vrot.slane %v1010_v37, 1  ;;  %v1124_v5 = vrot.slane %v1010_v37, 4  ;;  %v1178_v28 = vrot.slane %v1010_v37, 6  ;;  %v1070_v50 = vrot.slane %v1010_v37, 2 }
 0x1a5   : > { %v1097_v49 = vrot.slane %v1010_v37, 3  ;;  %v1151_v4 = vrot.slane %v1010_v37, 5  ;;  %v1205_v13 = vrot.slane %v1010_v37, 7 }
 0x1a6   : > { %1364 = vmatmul.msk.f32.vlgmr.msrb.gmra.mxu3 %vm1022_vm8, %v1021_v20  ;;  %1374 = vmatmul.msk.f32.vlgmr.msra.gmra.mxu2 %vm1022_vm8, %v1124_v5 }
 0x1a7   : > { %1087 = vmatpush.msrb.mxu3 %v1367_v22 }
 0x1a9   : > { %1088 = vmatpush.msrb.mxu3 %v1366_v52  ;;  %v989_v63 = vpop.f32.mrf.mxu1 }
 0x1aa   : > { %v1013_v55 = vadd.f32 %v1012_v25, %v989_v63 }
 0x1ac   : > { %1386 = vmatmul.msk.f32.vlgmr.msra.gmra.mxu1 %vm1022_vm8, %v1013_v55 }
 0x1ae   : > { %1365 = vmatmul.msk.f32.vlgmr.msra.gmra.mxu3 %vm1022_vm8, %v1010_v37  ;;  %1380 = vmatmul.msk.f32.vlgmr.msrb.gmra.mxu2 %vm1022_vm8, %v1178_v28 }
 0x1af   : > { %1114 = vmatpush.msra.mxu3 %v1370_v57 }
 0x1b1   : > { %1115 = vmatpush.msra.mxu3 %v1369_v33 }
 0x1b6   : > { %1368 = vmatmul.msk.f32.vlgmr.msrb.gmra.mxu3 %vm1022_vm8, %v1070_v50 }
 0x1b7   : > { %1168 = vmatpush.msrb.mxu3 %v1376_v47 }
 0x1b9   : > { %1169 = vmatpush.msrb.mxu3 %v1375_v40 }
 0x1be   : > { %1371 = vmatmul.msk.f32.vlgmr.msra.gmra.mxu3 %vm1022_vm8, %v1097_v49 }
 0x1bf   : > { %1222 = vmatpush.msra.mxu3 %v1382_v0 }
 0x1c1   : > { %1223 = vmatpush.msra.mxu3 %v1381_v38 }
 0x1c6   : > { %1377 = vmatmul.msk.f32.vlgmr.msrb.gmra.mxu3 %vm1022_vm8, %v1151_v4 }
 0x1ce   : > { %1383 = vmatmul.msk.f32.vlgmr.msra.gmra.mxu3 %vm1022_vm8, %v1205_v13 }
 0x229   : > { %v1042_v11 = vpop.f32.mrf.mxu3  ;;  %v1144_v8 = vpop.f32.mrf.mxu2 }
 0x22a   : > { %v1252_v35 = vpop.f32.mrf.mxu1 }
 0x231   : > { %v1064_v16 = vpop.f32.mrf.mxu3  ;;  %v1198_v32 = vpop.f32.mrf.mxu2 }
 0x232   : > { %v1065_v2 = vadd.f32 %v1064_v16, %v1042_v11 }
 0x239   : > { %v1090_v7 = vpop.f32.mrf.mxu3 }
 0x23a   : > { %v1093_v45 = vadd.f32 %v1090_v7, %v1065_v2 }
 0x241   : > { %v1117_v14 = vpop.f32.mrf.mxu3 }
 0x242   : > { %v1120_v46 = vadd.f32 %v1117_v14, %v1093_v45 }
 0x244   : > { %v1147_v6 = vadd.f32 %v1144_v8, %v1120_v46 }
 0x249   : > { %v1171_v61 = vpop.f32.mrf.mxu3 }
 0x24a   : > { %v1174_v24 = vadd.f32 %v1171_v61, %v1147_v6 }
 0x24c   : > { %v1201_v21 = vadd.f32 %v1198_v32, %v1174_v24 }
 0x251   : > { %v1225_v51 = vpop.f32.mrf.mxu3 }
 0x252   : > { %v1228_v10 = vadd.f32 %v1225_v51, %v1201_v21 }
 0x254   : > { %v1255_v62 = vadd.f32 %v1252_v35, %v1228_v10 }
 0x256   : > { %v1256_v18 = vmul.f32 0.0069444445, %v1255_v62 }
 0x258   : > { %v1258_v30 = vadd.f32 %v1257_v53, %v1256_v18 }
 0x25a   : > { %1259 = vst [vmem:[%s243_s14] sm:$0x1] %v1258_v30 }
 0x25b   : > { %1569 = shalt.err (!%p1566_p3)
}
 0x25c   : > { %1402 = dma.vmem_to_hbm [thread:$0]  (%p1679_p5), %s1272_s15, 16, %s1274_s16, %s1261_s17  }
 0x25d PF: > { %p1408_p4 = scmp.ge.s32.totalorder %s1604_s24, 2  ;;  %s1285_s29 = sand.u32 1, %s1592_s21  }
 0x25e   : > { %s1286_s10 = scalar_lea.sflag [#allocation3], %s1285_s29 }
 0x25f   : > { %p1405_p7 = pnand %p1408_p4, %p1683_p6 }
 0x261   : > { %p1406_p8 = pneg %p1405_p7 }
 0x263   : > { %1587 = dma.done.wait (%p1406_p8), %s1286_s10, 16  }
 0x264   : > { %1589 = vsyncadd (%p1406_p8), %s1286_s10, 4294967280  ;;  %p16_p9 = scmp.ge.s32.totalorder %s1666_s27, 4   ;;  %s2669_s21 = smov %s1596_s22 }
 0x265   : > { %s2670_s22 = smov %s1600_s23  ;;  %s2671_s23 = smov %s1677_s30 }
 0x266   : > { %s2672_s24 = smov %s1666_s27  ;;  %18 = sbr.rel (!%p16_p9) target bundleno = 3 (0x3), region = 87 }
 0x26b   :  { %1291 = vsyncpa [#allocation3], 1 }
 0x26c   :  { %1293 = vsyncpa [#allocation3 + $0x1], 1 }

</bundles_post_ra>
